<compile_context>
chip_gen: v7x
topology: tpu7x:2x2x1
jax: 0.10.0
libtpu: 0.0.40
codegen_flags: <defaults>
</compile_context>

<pallas_src>
import jax
import jax.numpy as jnp
from jax import lax
from jax.experimental import pallas as pl
from jax.experimental.pallas import tpu as pltpu

EPS = 1e-5
_LANE = 128
_TL_MAX = 32768   # 32ch * 32768 * 4B * 2 (double-buffer) = 8 MiB input VMEM at the cap


def _ri_outhead_kernel(x_ref, w_ref, sc_ref, out_ref):
    # x_ref : (1, Cin, TL)     -- channels on sublanes, flat spatial on lanes
    # w_ref : (1, Cin)  f32    -- conv_stage weight with BN scale folded in
    # sc_ref: SMEM (3,) f32    -- [bn_bias_folded, out_weight, out_bias]
    x = x_ref[0].astype(jnp.float32)                              # (Cin, TL)
    acc = jnp.dot(w_ref[...], x,
                  preferred_element_type=jnp.float32,
                  precision=lax.Precision.HIGHEST)                # (1, TL)
    h = jnp.maximum(acc + sc_ref[0], 0.0)                         # BN bias + ReLU
    out_ref[0] = (sc_ref[1] * h + sc_ref[2]).astype(out_ref.dtype)


def _choose_lane_tile(HW, N):
    """Lane tile: multiple of 128, capped at _TL_MAX, never exceeding HW
    (full-extent fallback only for HW < 128-multiple small cases), and split
    so the grid has >= 2 parallel steps when N == 1 (v7x megacore)."""
    hw_pad = pl.cdiv(HW, _LANE) * _LANE
    tl = min(_TL_MAX, hw_pad)
    if tl > HW:                      # HW small / not a 128-multiple and fits in one tile
        tl = HW                      # full-extent block is always legal
    if N == 1 and pl.cdiv(HW, tl) < 2 and HW > _LANE:
        tl = pl.cdiv(pl.cdiv(HW, 2), _LANE) * _LANE
        if tl > HW:
            tl = HW
    return tl, pl.cdiv(HW, tl)


def ri_outhead_pallas(x_nchw, params):
    """x_nchw: (N, 32, H, W) float32 or bfloat16.  Returns (N, 1, H, W) in x dtype."""
    N, Cin, H, W = x_nchw.shape
    HW = H * W

    conv_w = params["conv_w"]
    assert conv_w.shape == (1, Cin, 1, 1), "conv_stage expects 32->1 1x1 conv"
    assert params["out_w"].shape == (1, 1, 1, 1)

    # Fold BN (inference mode, running stats) into the 1x1 conv weight (f32).
    s = params["bn_g"].astype(jnp.float32) / jnp.sqrt(
        params["bn_v"].astype(jnp.float32) + EPS)                 # (1,)
    w1_scaled = conv_w.astype(jnp.float32)[:, :, 0, 0] * s[:, None]   # (1, Cin)
    b_fold = (params["bn_b"].astype(jnp.float32) - params["bn_m"].astype(jnp.float32) * s)[0]
    w_out = params["out_w"].astype(jnp.float32)[0, 0, 0, 0]
    b_out = params["out_b"].astype(jnp.float32)[0]
    scalars = jnp.stack([b_fold, w_out, b_out]).astype(jnp.float32)

    # Lane-dense layout: flatten spatial onto lanes.  NO dtype upcast here —
    # keep HBM read traffic at the input width; cast per-tile inside the kernel.
    x_flat = x_nchw.reshape(N, Cin, HW)
    out_dtype = x_nchw.dtype

    TL, n_tiles = _choose_lane_tile(HW, N)

    itemsize = jnp.dtype(x_nchw.dtype).itemsize
    cost = pl.CostEstimate(
        flops=2 * N * Cin * HW,
        transcendentals=0,
        bytes_accessed=N * Cin * HW * itemsize + N * HW * jnp.dtype(out_dtype).itemsize
                       + Cin * 4 + 3 * 4,
    )

    out_flat = pl.pallas_call(
        _ri_outhead_kernel,
        out_shape=jax.ShapeDtypeStruct((N, 1, HW), out_dtype),
        grid_spec=pltpu.PrefetchScalarGridSpec(
            num_scalar_prefetch=0,
            grid=(N, n_tiles),
            in_specs=[
                pl.BlockSpec((1, Cin, TL), lambda n, j: (n, 0, j)),
                pl.BlockSpec((1, Cin), lambda n, j: (0, 0)),
                pl.BlockSpec(memory_space=pltpu.MemorySpace.SMEM),
            ],
            out_specs=pl.BlockSpec((1, 1, TL), lambda n, j: (n, 0, j)),
        ),
        compiler_params=pltpu.CompilerParams(
            dimension_semantics=("parallel", "parallel"),
            vmem_limit_bytes=32 << 20),
        cost_estimate=cost,
    )(x_flat, w1_scaled, scalars)

    return out_flat.reshape(N, 1, H, W)


# ----------------------------- pure-JAX reference ----------------------------
def ri_outhead_ref(x, p):
    dn = ("NCHW", "OIHW", "NCHW")
    y = lax.conv_general_dilated(x.astype(jnp.float32), p["conv_w"], (1, 1), "VALID",
                                 dimension_numbers=dn,
                                 precision=lax.Precision.HIGHEST)
    s = p["bn_g"] / jnp.sqrt(p["bn_v"] + EPS)
    y = y * s.reshape(1, -1, 1, 1) + (p["bn_b"] - p["bn_m"] * s).reshape(1, -1, 1, 1)
    y = jax.nn.relu(y)
    y = lax.conv_general_dilated(y, p["out_w"], (1, 1), "VALID",
                                 dimension_numbers=dn,
                                 precision=lax.Precision.HIGHEST)
    return y + p["out_b"].reshape(1, -1, 1, 1)


# ------------------------------------ main -----------------------------------
if __name__ == "__main__":
    N, Cin, H, W = 2, 32, 16, 16          # module fixes Cin = 32

    key = jax.random.PRNGKey(0)
    ks = jax.random.split(key, 8)
    x = jax.random.normal(ks[0], (N, Cin, H, W), jnp.float32)

    params = {
        "conv_w": jax.random.normal(ks[1], (1, Cin, 1, 1), jnp.float32) * 0.1,
        "bn_g": 1.0 + 0.1 * jax.random.normal(ks[2], (1,), jnp.float32),
        "bn_b": 0.1 * jax.random.normal(ks[3], (1,), jnp.float32),
        "bn_m": 0.05 * jnp.ones((1,), jnp.float32),
        "bn_v": 1.0 + 0.02 * jnp.ones((1,), jnp.float32),
        "out_w": jax.random.normal(ks[4], (1, 1, 1, 1), jnp.float32) * 0.5,
        "out_b": 0.1 * jax.random.normal(ks[5], (1,), jnp.float32),
    }

    out = jax.block_until_ready(ri_outhead_pallas(x, params))
    ref = jax.block_until_ready(ri_outhead_ref(x, params))

    assert out.shape == (N, 1, H, W)
    assert jnp.max(jnp.abs(out - ref)) < 1e-4, "mismatch vs reference"
    print("KERNEL_OK")
</pallas_src>

<mosaic_0001>
module attributes {stable_mosaic.version = 11 : i64} {
  func.func @_ri_outhead_kernel(%arg0: i32, %arg1: i32, %arg2: memref<1x32x256xf32, #tpu.memory_space<vmem>>, %arg3: memref<1x32xf32, #tpu.memory_space<vmem>>, %arg4: memref<3xf32, #tpu.memory_space<smem>>, %arg5: memref<1x1x256xf32, #tpu.memory_space<vmem>>) attributes {dimension_semantics = [#tpu.dimension_semantics<parallel>, #tpu.dimension_semantics<parallel>], iteration_bounds = array<i64: 2, 1>, scalar_prefetch = 0 : i64, scratch_operands = 0 : i64, tpu.core_type = #tpu.core_type<tc>, window_params = [{transform_indices = @transform_0, window_bounds = array<i64: 1, 32, 256>}, {pipeline_mode = #tpu.pipeline_mode<synchronous>, transform_indices = @transform_1, window_bounds = array<i64: 1, 32>}, {transform_indices = @transform_2, window_bounds = array<i64: 3>}, {transform_indices = @transform_3, window_bounds = array<i64: 1, 1, 256>}]} {
    %c0 = arith.constant 0 : index
    %c0_0 = arith.constant 0 : index
    %c0_1 = arith.constant 0 : index
    %0 = vector.load %arg2[%c0, %c0_0, %c0_1] : memref<1x32x256xf32, #tpu.memory_space<vmem>>, vector<1x32x256xf32>
    %1 = vector.shape_cast %0 : vector<1x32x256xf32> to vector<32x256xf32>
    %c0_2 = arith.constant 0 : index
    %c0_3 = arith.constant 0 : index
    %2 = vector.load %arg3[%c0_2, %c0_3] : memref<1x32xf32, #tpu.memory_space<vmem>>, vector<1x32xf32>
    %cst = arith.constant dense<0.000000e+00> : vector<1x256xf32>
    %3 = tpu.matmul %2, %1, %cst {dimension_numbers = #tpu.dot_dimension_numbers<[1], [0], [0], [1], [0, 0, 1, 1], [], []>, precision = #tpu.contract_precision<fp32>} : vector<1x32xf32>, vector<32x256xf32>, vector<1x256xf32> -> vector<1x256xf32>
    %c0_4 = arith.constant 0 : index
    %4 = memref.load %arg4[%c0_4] : memref<3xf32, #tpu.memory_space<smem>>
    %5 = vector.broadcast %4 : f32 to vector<1x256xf32>
    %6 = arith.addf %3, %5 : vector<1x256xf32>
    %cst_5 = arith.constant 0.000000e+00 : f32
    %7 = vector.broadcast %cst_5 : f32 to vector<1x256xf32>
    %8 = arith.maximumf %6, %7 : vector<1x256xf32>
    %c1 = arith.constant 1 : index
    %9 = memref.load %arg4[%c1] : memref<3xf32, #tpu.memory_space<smem>>
    %10 = vector.broadcast %9 : f32 to vector<1x256xf32>
    %11 = arith.mulf %10, %8 : vector<1x256xf32>
    %c2 = arith.constant 2 : index
    %12 = memref.load %arg4[%c2] : memref<3xf32, #tpu.memory_space<smem>>
    %13 = vector.broadcast %12 : f32 to vector<1x256xf32>
    %14 = arith.addf %11, %13 : vector<1x256xf32>
    %c0_6 = arith.constant 0 : index
    %c0_7 = arith.constant 0 : index
    %c0_8 = arith.constant 0 : index
    %15 = vector.load %arg5[%c0_6, %c0_7, %c0_8] : memref<1x1x256xf32, #tpu.memory_space<vmem>>, vector<1x1x256xf32>
    %16 = vector.shape_cast %15 : vector<1x1x256xf32> to vector<1x256xf32>
    %17 = vector.shape_cast %14 : vector<1x256xf32> to vector<1x1x256xf32>
    tpu.vector_store %arg5[%c0_6, %c0_7, %c0_8], %17 {strides = array<i32>} : memref<1x1x256xf32, #tpu.memory_space<vmem>>, vector<1x1x256xf32>,
    return
  }
  func.func @transform_0(%arg0: i32, %arg1: i32) -> (i32, i32, i32) {
    %c0_i32 = arith.constant 0 : i32
    %c0_i32_0 = arith.constant 0 : i32
    return %arg0, %c0_i32, %arg1 : i32, i32, i32
  }
  func.func @transform_1(%arg0: i32, %arg1: i32) -> (i32, i32) {
    %c0_i32 = arith.constant 0 : i32
    %c0_i32_0 = arith.constant 0 : i32
    %c0_i32_1 = arith.constant 0 : i32
    return %c0_i32, %c0_i32_0 : i32, i32
  }
  func.func @transform_2(%arg0: i32, %arg1: i32) -> i32 {
    %c0_i32 = arith.constant 0 : i32
    %c0_i32_0 = arith.constant 0 : i32
    return %c0_i32 : i32
  }
  func.func @transform_3(%arg0: i32, %arg1: i32) -> (i32, i32, i32) {
    %c0_i32 = arith.constant 0 : i32
    %c0_i32_0 = arith.constant 0 : i32
    return %arg0, %c0_i32, %arg1 : i32, i32, i32
  }
}

</mosaic_0001>

<bundles_post_ra>
// kernel: tpu_custom_call.1
= control target key start
LH: loop header
LB: loop body
LE: loop exit
PB: predicated region body
PF: predicated region fallthrough
CT: control target
= control target key end

     0   :  { %8 = vsyncpa [#allocation3], 0  ;;  %s1531_s0 = inlined_call_operand.hbm [shape: f32[2,32,256], index: 0, kind: input, shape index: {}]   ;;  %s1532_s1 = inlined_call_operand.vmem [shape: f32[1,32], index: 1, kind: input, shape index: {}]   ;;  %s1533_s2 = inlined_call_operand.vmem [shape: f32[3], index: 2, kind: input, shape index: {}]   ;;  %s1534_s3 = inlined_call_operand.hbm [shape: f32[2,1,256], index: 3, kind: output, shape index: {}]  }
   0x1   :  { %10 = vsyncpa [#allocation3 + $0x1], 0 }
   0x2   :  { %11 = vsyncpa [#allocation5], 0 }
   0x3   :  { %12 = vsyncpa [#allocation4], 0 }
   0x4   :  { %14 = vsyncpa [#allocation4 + $0x1], 0  ;;  %s1245_s12 = smov 0   ;;  %s1247_s13 = smov 0  }
   0x5   :  { %s1249_s14 = smov 0   ;;  %s1251_s15 = smov 0  }
   0x6   :  { %s1253_s16 = smov 0   ;;  %s1255_s17 = smov 0  }
   0x7 LB: > { %s927_s18 = sadd.s32 4294967295, %s1216_s17   ;;  %s928_s19 = sadd.s32 4294967294, %s1216_s17   ;;  %s1216_s17 = sphi %s1255_s17, %s20_s17   ;;  %s1212_s16 = sphi %s1253_s16, %s1557_s16   ;;  %s1208_s15 = sphi %s1251_s15, %s1556_s15   ;;  %s1204_s14 = sphi %s1249_s14, %s1555_s14   ;;  %s1200_s13 = sphi %s1247_s13, %s1554_s13   ;;  %s1196_s12 = sphi %s1245_s12, %s1553_s12  }
   0x8   : > { %s41_s20 = sadd.s32 1, %s1204_s14  ;;  %p48_p0 = scmp.ne.s32.totalorder %s1204_s14, %s1200_s13 }
   0x9   : > { %p49_p1 = scmp.eq.s32.totalorder %s1216_s17, 0  ;;  %p54_p2 = scmp.ne.s32.totalorder %s1200_s13, %s1196_s12 }
   0xa   : > { %p1283_p3 = scmp.eq.s32.totalorder %s927_s18, 0  ;;  %p122_p4 = scmp.eq.s32.totalorder %s927_s18, 1 }
   0xb   : > { %p1287_p5 = por %p49_p1, %p48_p0  ;;  %p128_p6 = scmp.eq.s32.totalorder %s928_s19, 1 }
   0xc   : > { %s1539_s21 = scalar_select %p1283_p3, 1, 0 }
   0xd   : > { %p1293_p7 = por %p1283_p3, %p54_p2  ;;  %p1297_p8 = por %p122_p4, %p48_p0 }
   0xe   : > { %p1301_p9 = por %p128_p6, %p54_p2  ;;  %p929_p10 = scmp.ge.s32.totalorder %s1216_s17, 1 }
   0xf   : > { %s1541_s23 = scalar_select %p1293_p7, 1, 0 }
  0x10   : > { %s1542_s24 = scalar_select %p1297_p8, 1, 0 }
  0x11   : > { %s1543_s25 = scalar_select %p1301_p9, 1, 0 }
  0x12   : > { %p135_p11 = scmp.lt.s32.totalorder %s1216_s17, 3  ;;  %s151_s28 = sshll.u32 %s1533_s2, 4  ;;  %s152_s28 = int_to_ptr.vmem [resolvable:$true] %s151_s28 }
  0x13   : > { %p1029_p0 = scmp.lt.s32.totalorder %s1216_s17, 2  ;;  %s32_s5 = sadd.s32 1, %s1212_s16 }
  0x14   : > { %p1310_p12 = pnand %p929_p10, %p135_p11  ;;  %p1331_p6 = scmp.ge.s32.totalorder %s32_s5, 2 }
  0x15   : > { %p1320_p2 = pnand %p1029_p0, %p1287_p5  ;;  %s162_s7 = sand.u32 1, %s1204_s14  }
  0x16   : > { %p1016_p1 = pneg %p1310_p12  ;;  %s1085_s8 = scalar_lea.vmem %s152_s28, 16 }
  0x17   : > { %p1086_p10 = scmp.ne.s32.totalorder %s152_s28, %s1085_s8  ;;  %p1093_p13 = scmp.lt.s32.totalorder %s152_s28, %s152_s28 }
  0x18   : > { %p1326_p4 = pnand %p1016_p1, %p1283_p3  ;;  %p1094_p9 = scmp.lt.s32.totalorder %s1085_s8, %s1085_s8 }
  0x1a   : > { %p1087_p11 = pneg %p1326_p4  ;;  %p1095_p8 = por %p1094_p9, %p1093_p13 }
  0x1c   : > { %p1088_p5 = pnand %p1087_p11, %p1086_p10 }
  0x1e   : > { %p1089_p0 = pneg %p1088_p5 }
  0x20   : > { %p1096_p1 = pnand %p1095_p8, %p1089_p0 }
  0x22   : > { %1099 = shalt.err (!%p1096_p1)
}
  0x23   : > { %s1218_s9 = smov [#allocation6]   ;;  %s1559_s5 = smov (%p1331_p6, %s32_s5), 0 }
  0x24   : > { %1019 = dma.vmem_to_smem (!%p1326_p4), %s152_s28, 16, %s1218_s9, [#allocation5]  }
  0x25   : > { %s932_s10 = sshll.u32 %s162_s7, 6  ;;  %s36_s11 = ssub.s32 %s1212_s16, %s1559_s5 }
  0x26   : > { %p39_p9 = scmp.eq.s32.totalorder %s36_s11, 0  ;;  %s946_s18 = sshll.u32 %s1212_s16, 10 }
  0x27   : > { %s1350_s26 = scalar_lea.hbm %s1531_s0, %s946_s18  ;;  %s166_s27 = scalar_lea.vmem [#allocation2], %s932_s10 }
  0x28   : > { %s175_s4 = sshll.u32 %s166_s27, 4  ;;  %s1359_s6 = scalar_lea.sflag [#allocation3], %s162_s7  ;;  %s1357_s4 = int_to_ptr.vmem [resolvable:$true] %s175_s4 }
  0x29   : > { %s1355_s28 = scalar_select %p39_p9, %s1204_s14, %s41_s20  }
  0x2a   : > { %s1100_s8 = scalar_lea.hbm %s1350_s26, 1024  ;;  %p1102_p13 = pneg %p1320_p2 }
  0x2b   : > { %p1101_p8 = scmp.ne.s32.totalorder %s1350_s26, %s1100_s8  ;;  %s1105_s10 = scalar_lea.hbm %s1531_s0, 2048 }
  0x2c   : > { %p1106_p10 = scmp.lt.u32.totalorder %s1350_s26, %s1531_s0  ;;  %p1107_p11 = scmp.lt.u32.totalorder %s1105_s10, %s1100_s8 }
  0x2d   : > { %p1103_p4 = pnand %p1102_p13, %p1101_p8  ;;  %p1109_p0 = scmp.lt.u32.totalorder %s1100_s8, %s1350_s26 }
  0x2e   : > { %p1108_p5 = por %p1107_p11, %p1106_p10 }
  0x2f   : > { %p1104_p6 = pneg %p1103_p4 }
  0x30   : > { %p1110_p1 = por %p1109_p0, %p1108_p5 }
  0x32   : > { %p1111_p9 = pnand %p1110_p1, %p1104_p6 }
  0x34   : > { %1114 = shalt.err (!%p1111_p9)
}
  0x35   : > { %s1115_s20 = scalar_lea.vmem %s1357_s4, 1024  ;;  %s1219_s7 = smov [#allocation2]  }
  0x36   : > { %p1116_p8 = scmp.ne.s32.totalorder %s1357_s4, %s1115_s20  ;;  %s1120_s22 = sshll.u32 %s1219_s7, 4  ;;  %s1121_s22 = int_to_ptr.vmem [resolvable:$false] %s1120_s22 }
  0x37   : > { %s1122_s27 = scalar_lea.vmem %s1121_s22, 2048  ;;  %p1123_p7 = scmp.lt.s32.totalorder %s1357_s4, %s1121_s22 }
  0x38   : > { %p1118_p4 = pnand %p1116_p8, %p1102_p13  ;;  %p1124_p10 = scmp.lt.s32.totalorder %s1122_s27, %s1115_s20 }
  0x3a   : > { %p1119_p3 = pneg %p1118_p4  ;;  %p1125_p11 = por %p1124_p10, %p1123_p7 }
  0x3c   : > { %p1126_p5 = pnand %p1125_p11, %p1119_p3 }
  0x3e   : > { %1129 = shalt.err (!%p1126_p5)
}
  0x3f   : > { %s1220_s8 = smov 256   ;;  %s1221_s9 = smov 16  }
  0x40   : > { %1023 = dma.hbm_to_vmem [thread:$0]  (!%p1320_p2), %s1350_s26, 1024, %s1357_s4, %s1359_s6, %s1220_s8, %s1220_s8, %s1221_s9  }
  0x41   : > { %187 = sbr.rel (%p1310_p12) target bundleno = 353 (0x161), region = 32  ;;  %s1390_s11 = sand.u32 (!%p1310_p12), 1, %s1200_s13  }
  0x42   : > { %s936_s10 = sshll.u32 (!%p1310_p12), %s1390_s11, 6  ;;  %s190_s18 = scalar_lea.sflag (!%p1310_p12), [#allocation3], %s1390_s11 }
  0x43   : > { %s193_s19 = scalar_lea.vmem (!%p1310_p12), [#allocation2], %s936_s10  ;;  %p1548_p3 = scmp.ne.s32.totalorder (!%p1310_p12), %s1541_s23, 0 }
  0x48   : > { %1183 = dma.done.wait (%p1548_p3), %s190_s18, 1024  }
  0x49   : > { %1185 = vsyncadd (%p1548_p3), %s190_s18, 4294966272  ;;  %p1549_p7 = scmp.ne.s32.totalorder %s1539_s21, 0 }
  0x4b   : > { %1187 = dma.done.wait (%p1549_p7), [#allocation5], 16  }
  0x4c   : > { %1189 = vsyncadd (%p1549_p7), [#allocation5], 4294967280 }
  0x4d   : > { %202 = sfence }
  0x4e   : > { %v224_v0 = vld [vmem:[%s193_s19 + $0x8] sm:$0xff]  ;;  %v226_v1 = vld [vmem:[%s193_s19 + $0x18] sm:$0xff]  ;;  %v223_v2 = vld [vmem:[%s193_s19] sm:$0xff]  ;;  %v1222_v9 = vmov 0.0   ;;  %vm234_vm0 = vcmask 261120   ;;  %s232_s29 = sld [smem:[#allocation6]] }
  0x4f   : > { %v238_v3 = vand.u32 4294901760, %v224_v0  ;;  %v242_v4 = vand.u32 4294901760, %v226_v1  ;;  %v225_v5 = vld [vmem:[%s193_s19 + $0x10] sm:$0xff]  ;;  %v240_v6 = vand.u32 4294901760, %v223_v2  ;;  %v228_v7 = vld [vmem:[%s193_s19 + $0x28] sm:$0xff]  ;;  %v230_v8 = vld [vmem:[%s193_s19 + $0x38] sm:$0xff]  ;;  %310 = vmatprep.mubr.f32.mxu1 %v1222_v9  ;;  %595 = vmatprep.mubr.f32.mxu0 %v1222_v9 }
  0x50   : > { %v244_v10 = vand.u32 4294901760, %v225_v5  ;;  %v246_v11 = vand.u32 4294901760, %v228_v7  ;;  %v250_v12 = vand.u32 4294901760, %v230_v8  ;;  %v227_v13 = vld [vmem:[%s193_s19 + $0x20] sm:$0xff]  ;;  %v229_v14 = vld [vmem:[%s193_s19 + $0x30] sm:$0xff]  ;;  %s939_s30 = sld [smem:[#allocation6 + $0x1]] }
  0x51   : > { %v1404_v15 = vpack.c.bf16 %v242_v4, %v238_v3  ;;  %v1406_v16 = vsub.f32 %v224_v0, %v238_v3  ;;  %v1408_v17 = vsub.f32 %v226_v1, %v242_v4  ;;  %v1410_v18 = vsub.f32 %v223_v2, %v240_v6  ;;  %v231_v19 = vld [vmem:[%s1532_s1] sm:$0x1]  ;;  %s940_s26 = sld [smem:[#allocation6 + $0x2]]  ;;  %s938_s4 = sshll.u32 %s1390_s11, 1 }
  0x52   : > { %v1415_v20 = vpack.c.bf16 %v244_v10, %v240_v6  ;;  %v1417_v21 = vsub.f32 %v225_v5, %v244_v10  ;;  %v1419_v22 = vpack.c.bf16 %v250_v12, %v246_v11  ;;  %v1421_v23 = vsub.f32 %v228_v7, %v246_v11  ;;  %s947_s6 = sshll.u32 %s1208_s15, 5  ;;  %s220_s20 = scalar_lea.vmem [#allocation7], %s938_s4 }
  0x53   : > { %949 = vmatprep.subr.bf16.mxu1 %v1404_v15  ;;  %973 = vmatprep.subr.bf16.mxu0 %v1404_v15  ;;  %v1425_v24 = vsub.f32 %v230_v8, %v250_v12  ;;  %v248_v25 = vand.u32 4294901760, %v227_v13  ;;  %v252_v26 = vand.u32 4294901760, %v229_v14  ;;  %v236_v27 = vsel %vm234_vm0, %v231_v19, 0  ;;  %s831_s7 = sshll.u32 %s220_s20, 4  ;;  %s1482_s8 = scalar_lea.hbm %s1534_s3, %s947_s6  ;;  %s1484_s7 = int_to_ptr.vmem [resolvable:$true] %s831_s7 }
  0x54   : > { %951 = vmatpush1.bf16.msra.mxu1 %v1415_v20  ;;  %975 = vmatpush1.bf16.msra.mxu0 %v1415_v20  ;;  %v1429_v28 = vand.u32 4294901760, %v236_v27  ;;  %v324_v29 = vand.u32 4294901760, %v1406_v16  ;;  %v336_v30 = vand.u32 4294901760, %v1408_v17  ;;  %v330_v31 = vand.u32 4294901760, %v1410_v18  ;;  %s815_s9 = scalar_lea.sflag [#allocation4], %s1390_s11  ;;  %s1130_s10 = scalar_lea.vmem %s1484_s7, 32 }
  0x55   : > { %953 = vmatprep.subr.bf16.mxu1 %v1419_v22  ;;  %977 = vmatprep.subr.bf16.mxu0 %v1419_v22  ;;  %v1436_v32 = vpack.c.bf16 %v252_v26, %v248_v25  ;;  %v1438_v33 = vsub.f32 %v227_v13, %v248_v25  ;;  %v1440_v34 = vsub.f32 %v229_v14, %v252_v26  ;;  %v342_v35 = vand.u32 4294901760, %v1417_v21  ;;  %p1131_p12 = scmp.ne.s32.totalorder %s1484_s7, %s1130_s10  ;;  %p1550_p2 = scmp.ne.s32.totalorder %s1542_s24, 0 }
  0x56   : > { %v312_v36 = vsub.f32 %v236_v27, %v1429_v28  ;;  %v325_v37 = vsub.f32 %v1406_v16, %v324_v29  ;;  %v337_v38 = vsub.f32 %v1408_v17, %v336_v30  ;;  %v980_v39 = vpack.c.bf16 %v336_v30, %v324_v29  ;;  %s1224_s15 = smov [#allocation7]  }
  0x57   : > { %v331_v40 = vsub.f32 %v1410_v18, %v330_v31  ;;  %v343_v41 = vsub.f32 %v1417_v21, %v342_v35  ;;  %v982_v42 = vpack.c.bf16 %v342_v35, %v330_v31  ;;  %v348_v43 = vand.u32 4294901760, %v1421_v23  ;;  %p1132_p13 = pnand %p1131_p12, %p1550_p2  ;;  %s1134_s18 = sshll.u32 %s1224_s15, 4  ;;  %s1135_s18 = int_to_ptr.vmem [resolvable:$false] %s1134_s18 }
  0x58   : > { %955 = vmatpush1.bf16.msra.mxu1 %v1436_v32  ;;  %979 = vmatpush1.bf16.msra.mxu0 %v1436_v32  ;;  %v313_v44 = vand.u32 4294901760, %v312_v36  ;;  %v326_v45 = vand.u32 4294901760, %v325_v37  ;;  %v338_v46 = vand.u32 4294901760, %v337_v38  ;;  %v360_v47 = vand.u32 4294901760, %v1425_v24  ;;  %s1136_s19 = scalar_lea.vmem %s1135_s18, 64  ;;  %p1137_p0 = scmp.lt.s32.totalorder %s1484_s7, %s1135_s18 }
  0x59   : > { %981 = vmatprep.subr.bf16.mxu0 %v980_v39  ;;  %v332_v48 = vand.u32 4294901760, %v331_v40  ;;  %v344_v49 = vand.u32 4294901760, %v343_v41  ;;  %v349_v50 = vsub.f32 %v1421_v23, %v348_v43  ;;  %v354_v51 = vand.u32 4294901760, %v1438_v33  ;;  %p1133_p6 = pneg %p1132_p13  ;;  %p1138_p1 = scmp.lt.s32.totalorder %s1136_s19, %s1130_s10 }
  0x5a   : > { %v314_v52 = vsub.f32 %v312_v36, %v313_v44  ;;  %v956_v53 = vpack.c.bf16 %v338_v46, %v326_v45  ;;  %v361_v54 = vsub.f32 %v1425_v24, %v360_v47  ;;  %v984_v55 = vpack.c.bf16 %v360_v47, %v348_v43 }
  0x5b   : > { %599 = vmatmul.mubr.f32.vlgmr.msra.gmra.mrb[0].mxu0 %v313_v44  ;;  %v958_v56 = vpack.c.bf16 %v344_v49, %v332_v48  ;;  %v350_v57 = vand.u32 4294901760, %v349_v50  ;;  %v355_v58 = vsub.f32 %v1438_v33, %v354_v51  ;;  %v366_v59 = vand.u32 4294901760, %v1440_v34  ;;  %p1139_p9 = por %p1138_p1, %p1137_p0 }
  0x5c   : > { %v315_v60 = vand.u32 4294901760, %v314_v52  ;;  %957 = vmatprep.subr.bf16.mxu1 %v956_v53  ;;  %983 = vmatpush1.bf16.msra.mxu0 %v982_v42  ;;  %v362_v61 = vand.u32 4294901760, %v361_v54  ;;  %v964_v3 = vpack.c.bf16 %v1408_v17, %v1406_v16  ;;  %v966_v5 = vpack.c.bf16 %v1417_v21, %v1410_v18 }
  0x5d   : > { %985 = vmatprep.subr.bf16.mxu0 %v984_v55  ;;  %v356_v62 = vand.u32 4294901760, %v355_v58  ;;  %v367_v63 = vsub.f32 %v1440_v34, %v366_v59  ;;  %v986_v0 = vpack.c.bf16 %v366_v59, %v354_v51  ;;  %693 = vmatprep.mubr.f32.mxu0 %v1222_v9  ;;  %v968_v6 = vpack.c.bf16 %v1425_v24, %v1421_v23  ;;  %p1140_p8 = pnand %p1139_p9, %p1133_p6 }
  0x5e   : > { %316 = vmatmul.mubr.f32.vlgmr.msra.gmra.mrb[0].mxu1 %v315_v60  ;;  %v960_v1 = vpack.c.bf16 %v362_v61, %v350_v57  ;;  %v970_v7 = vpack.c.bf16 %v1440_v34, %v1438_v33  ;;  %v233_v10 = vstv %s232_s29  ;;  %v1223_v16 = vmov 1966171168  }
  0x5f   : > { %959 = vmatpush1.bf16.msra.mxu1 %v958_v56  ;;  %v368_v2 = vand.u32 4294901760, %v367_v63  ;;  %426 = vmatprep.mubr.f32.mxu1 %v1222_v9  ;;  %v797_v17 = vlaneseq  ;;  %v784_v19 = vstv %s939_s30 }
  0x60   : > { %961 = vmatprep.subr.bf16.mxu1 %v960_v1  ;;  %987 = vmatpush1.bf16.msra.mxu0 %v986_v0 }
  0x61   : > { %v962_v4 = vpack.c.bf16 %v368_v2, %v356_v62  ;;  %989 = vmatprep.subr.bf16.mxu0 %v1404_v15  ;;  %v798_v25 = vshrl.u32 %v797_v17, 7  ;;  %vm811_vm1 = vcmp.lt.s32.totalorder %v797_v17, 256 }
  0x63   : > { %963 = vmatpush1.bf16.msra.mxu1 %v962_v4  ;;  %695 = vmatmul.mubr.f32.vlgmr.msra.gmra.mrb[0].mxu0 %v1429_v28 }
  0x64   : > { %965 = vmatprep.subr.bf16.mxu1 %v964_v3  ;;  %991 = vmatpush1.bf16.msra.mxu0 %v1415_v20 }
  0x65   : > { %993 = vmatprep.subr.bf16.mxu0 %v1419_v22  ;;  %773 = vmatprep.mubr.f32.mxu0 %v1222_v9  ;;  %v788_v22 = vstv %s940_s26 }
  0x66   : > { %428 = vmatmul.mubr.f32.vlgmr.msra.gmra.mrb[0].mxu1 %v1429_v28 }
  0x67   : > { %967 = vmatpush1.bf16.msra.mxu1 %v966_v5  ;;  %514 = vmatprep.mubr.f32.mxu1 %v1222_v9  ;;  %v795_v9 = vunpack.c.l.s4 %v1223_v16 }
  0x68   : > { %969 = vmatprep.subr.bf16.mxu1 %v968_v6  ;;  %995 = vmatpush1.bf16.msra.mxu0 %v1436_v32 }
  0x69   : > { %v796_v24 = vunpack.c.0.s8 %v795_v9 }
  0x6b   : > { %971 = vmatpush1.bf16.msra.mxu1 %v970_v7  ;;  %775 = vmatmul.mubr.f32.vlgmr.msra.gmra.mrb[0].mxu0 %v1429_v28  ;;  %v799_v30 = vsub.s32 %v796_v24, %v798_v25 }
  0x6e   : > { %517 = vmatmul.mubr.f32.vlgmr.msra.gmra.mrb[0].mxu1 %v312_v36 }
 0x13e   : > { %v776_v8 = vpop.f32.mrb[0].mxu0 }
 0x13f   : > { %v778_v11 = vpop.f32.mrb[1].mxu0 }
 0x141   : > { %v518_v12 = vpop.f32.mrb[0].mxu1 }
 0x142   : > { %v996_v13 = vadd.f32 %v518_v12, %v233_v10  ;;  %v520_v14 = vpop.f32.mrb[1].mxu1 }
 0x143   : > { %v998_v15 = vadd.f32 %v520_v14, %v233_v10 }
 0x144   : > { %v997_v18 = vadd.f32 %v996_v13, %v776_v8 }
 0x145   : > { %v999_v20 = vadd.f32 %v998_v15, %v778_v11 }
 0x146   : > { %v781_v21 = vmax.f32 %v997_v18, 0.0 }
 0x147   : > { %v782_v23 = vmax.f32 %v999_v20, 0.0 }
 0x148   : > { %v785_v26 = vmul.f32 %v784_v19, %v781_v21 }
 0x149   : > { %v786_v27 = vmul.f32 %v784_v19, %v782_v23 }
 0x14a   : > { %v789_v28 = vadd.f32 %v788_v22, %v785_v26 }
 0x14b   : > { %v790_v29 = vadd.f32 %v788_v22, %v786_v27 }
 0x14d   : > { %v793_v31 = vcombine.low %v789_v28, %v790_v29 }
 0x14f   : > { %v800_v32 = vrot.slane %v793_v31, %v799_v30 }
 0x151   : > { %v807_v33 = vrot.slane %v800_v32, %v799_v30 }
 0x153   : > { %813 = vst.msk [vmem:[%s220_s20] sm:$0x3] %vm811_vm1, %v807_v33 }
 0x154   : > { %1143 = shalt.err (!%p1140_p8)
}
 0x155   : > { %s1144_s11 = scalar_lea.hbm %s1482_s8, 32  ;;  %s1148_s29 = scalar_lea.hbm %s1534_s3, 64 }
 0x156   : > { %p1145_p4 = scmp.ne.s32.totalorder %s1482_s8, %s1144_s11  ;;  %p1149_p5 = scmp.lt.u32.totalorder %s1482_s8, %s1534_s3 }
 0x157   : > { %p1150_p3 = scmp.lt.u32.totalorder %s1148_s29, %s1144_s11  ;;  %p1152_p12 = scmp.lt.u32.totalorder %s1144_s11, %s1482_s8 }
 0x158   : > { %p1146_p10 = pnand %p1145_p4, %p1550_p2 }
 0x159   : > { %p1151_p7 = por %p1150_p3, %p1149_p5 }
 0x15a   : > { %p1147_p11 = pneg %p1146_p10 }
 0x15b   : > { %p1153_p13 = por %p1152_p12, %p1151_p7 }
 0x15d   : > { %p1154_p6 = pnand %p1153_p13, %p1147_p11 }
 0x15f   : > { %1157 = shalt.err (!%p1154_p6)
}
 0x160   : > { %1014 = dma.vmem_to_hbm [thread:$0]  (%p1550_p2), %s1484_s7, 32, %s1482_s8, %s815_s9  }
 0x161 PF: > { %s843_s4 = sand.u32 1, %s1196_s12   ;;  %p1551_p0 = scmp.ne.s32.totalorder %s1543_s25, 0 }
 0x162   : > { %p1552_p1 = scmp.ge.s32.totalorder %s1216_s17, 2  ;;  %s844_s6 = scalar_lea.sflag [#allocation4], %s843_s4 }
 0x164   : > { %p1025_p9 = pnand %p1552_p1, %p1551_p0 }
 0x166   : > { %1191 = dma.done.wait (!%p1025_p9), %s844_s6, 32  }
 0x167   : > { %1193 = vsyncadd (!%p1025_p9), %s844_s6, 4294967264  ;;  %s20_s17 = sadd.s32 1, %s1216_s17   ;;  %s1553_s12 = smov %s1200_s13 }
 0x168   : > { %p17_p8 = scmp.ge.s32.totalorder %s20_s17, 4   ;;  %s1554_s13 = smov %s1204_s14 }
 0x169   : > { %s1555_s14 = smov %s1355_s28  ;;  %s1556_s15 = smov %s1212_s16 }
 0x16a   : > { %s1557_s16 = smov %s1559_s5  ;;  %19 = sbr.rel (!%p17_p8) target bundleno = 7 (0x7), region = 82 }
 0x171   :  { %849 = vsyncpa [#allocation3], 1 }
 0x172   :  { %851 = vsyncpa [#allocation3 + $0x1], 1 }
 0x173   :  { %852 = vsyncpa [#allocation4], 1 }
 0x174   :  { %854 = vsyncpa [#allocation4 + $0x1], 1 }
 0x175   :  { %855 = vsyncpa [#allocation5], 1 }
 0x176   :  { %857 = vsyncpa [#allocation5 + $0x1], 1 }

</bundles_post_ra>
